<compile_context>
chip_gen: v5e
topology: v5e:2x2
jax: 0.10.0
libtpu: 0.0.40
codegen_flags: <defaults>
</compile_context>

<pallas_src>
import jax
import jax.numpy as jnp
from jax.experimental import pallas as pl
from jax.experimental.pallas import tpu as pltpu

LANES = 128  # fc1_units == fc2_units == 128 == TPU lane width


def actor_kernel(x_ref, w1_ref, w23_ref, v_ref, out_ref):
    """Whole forward pass in one kernel.

    x_ref:   [B, S]        raw state, f32 (cast to bf16 in-kernel for the MXU)
    w1_ref:  [S, 128]      fc1 weight, bf16
    w23_ref: [256, 128]    rows [0:128]=w2, rows [128:256]=w3 (cols zero-padded
                           beyond action_size), bf16, 16-row-aligned sections
    v_ref:   [8, 128]      f32 rows: b1, gamma, beta, b2, b3 (b3 zero-padded)
    out_ref: [B, 128]      lane-dense output; consumer slices action_size
    """
    x = x_ref[...].astype(jnp.bfloat16)          # [B, S]
    w1 = w1_ref[...]                             # [S, 128] bf16
    w2 = w23_ref[0:LANES, :]                     # tile-aligned bf16 view
    w3 = w23_ref[LANES:2 * LANES, :]             # tile-aligned bf16 view

    # Hoisted [1,128] f32 parameter rows (never re-sliced in a loop).
    b1 = v_ref[0:1, :]
    gamma = v_ref[1:2, :]
    beta = v_ref[2:3, :]
    b2 = v_ref[3:4, :]
    b3 = v_ref[4:5, :]

    # --- fc1 + ReLU (bf16 MXU, f32 accumulate) ---
    h1 = jnp.dot(x, w1, preferred_element_type=jnp.float32) + b1
    h1 = jnp.maximum(h1, 0.0)

    # --- BatchNorm1d, training mode (biased batch stats, eps=1e-5), folded
    #     into a single scale/shift FMA. Single-pass variance in f32 on the
    #     f32-accumulated h1 (do NOT port this form to bf16 accumulation). ---
    eps = 1e-5
    inv_b = 1.0 / h1.shape[0]
    mean = jnp.sum(h1, axis=0, keepdims=True) * inv_b
    mean_sq = jnp.sum(h1 * h1, axis=0, keepdims=True) * inv_b
    var = mean_sq - mean * mean
    scale = gamma * jax.lax.rsqrt(var + eps)     # [1, 128]
    shift = beta - mean * scale                  # [1, 128]
    h1n = h1 * scale + shift

    # --- fc2 + ReLU ---
    h2 = jnp.dot(h1n.astype(jnp.bfloat16), w2,
                 preferred_element_type=jnp.float32) + b2
    h2 = jnp.maximum(h2, 0.0)

    # --- fc3 + tanh (padded lanes are exactly tanh(0) = 0) ---
    h3 = jnp.dot(h2.astype(jnp.bfloat16), w3,
                 preferred_element_type=jnp.float32) + b3
    out_ref[...] = jnp.tanh(h3).astype(out_ref.dtype)


def pack_actor_params(params):
    """One-time packing of the 8 parameter arrays into 3 DMA-friendly slabs."""
    w1, b1, gamma, beta, w2, b2, w3, b3 = params
    f1, f2 = w1.shape[1], w2.shape[1]
    action_size = w3.shape[1]
    assert f1 == LANES and f2 == LANES, "kernel assumes fc1_units=fc2_units=128"

    w1_bf = w1.astype(jnp.bfloat16)                               # [S, 128]
    w3p = jnp.zeros((LANES, LANES), jnp.float32).at[:, :action_size].set(w3)
    w23 = jnp.concatenate([w2, w3p], axis=0).astype(jnp.bfloat16)  # [256, 128]

    v_slab = jnp.zeros((8, LANES), jnp.float32)
    v_slab = v_slab.at[0, :].set(b1.reshape(-1))
    v_slab = v_slab.at[1, :].set(gamma.reshape(-1))
    v_slab = v_slab.at[2, :].set(beta.reshape(-1))
    v_slab = v_slab.at[3, :].set(b2.reshape(-1))
    v_slab = v_slab.at[4, :action_size].set(b3.reshape(-1))
    return w1_bf, w23, v_slab, action_size


@jax.jit
def actor_forward_packed(state, w1_bf, w23, v_slab):
    """state: [B, state_size] f32. Returns lane-dense [B, 128] f32.

    Columns >= action_size are exact zeros; the consumer slices (or masks)
    where it fuses for free.  BatchNorm uses full-batch statistics, so feed
    the whole (replay) batch through ONE call.
    """
    B = state.shape[0]
    vmem = lambda: pl.BlockSpec(memory_space=pltpu.MemorySpace.VMEM)
    # Un-gridded: whole net fits trivially in VMEM at DDPG batch sizes.
    # For very large B on v7x, add a "parallel" batch grid + two-pass BN.
    return pl.pallas_call(
        actor_kernel,
        out_shape=jax.ShapeDtypeStruct((B, LANES), jnp.float32),
        in_specs=[vmem(), vmem(), vmem(), vmem()],
        out_specs=vmem(),
    )(state, w1_bf, w23, v_slab)


def init_actor_params(key, state_size, action_size, fc1_units=128, fc2_units=128):
    """Deterministic init mirroring the PyTorch module's reset_parameters().

    Note: the reference's hidden_init() uses weight.size()[0] (== out_features),
    so lim = 1/sqrt(fc1_units) for both fc1 and fc2 weights (quirk reproduced).
    Biases keep the default nn.Linear init: U(-1/sqrt(in_features), ...).
    """
    keys = jax.random.split(key, 6)
    lim_hidden = 1.0 / jnp.sqrt(jnp.float32(fc1_units))
    lim_b1 = 1.0 / jnp.sqrt(jnp.float32(state_size))
    lim_b2 = 1.0 / jnp.sqrt(jnp.float32(fc1_units))
    lim_b3 = 1.0 / jnp.sqrt(jnp.float32(fc2_units))

    # Weights stored pre-transposed: [in_features, out_features]
    w1 = jax.random.uniform(keys[0], (state_size, fc1_units), jnp.float32,
                            -lim_hidden, lim_hidden)
    b1 = jax.random.uniform(keys[1], (1, fc1_units), jnp.float32, -lim_b1, lim_b1)
    gamma = jnp.ones((1, fc1_units), jnp.float32)   # BatchNorm1d affine defaults
    beta = jnp.zeros((1, fc1_units), jnp.float32)
    w2 = jax.random.uniform(keys[2], (fc1_units, fc2_units), jnp.float32,
                            -lim_hidden, lim_hidden)
    b2 = jax.random.uniform(keys[3], (1, fc2_units), jnp.float32, -lim_b2, lim_b2)
    w3 = jax.random.uniform(keys[4], (fc2_units, action_size), jnp.float32,
                            -0.003, 0.003)
    b3 = jax.random.uniform(keys[5], (1, action_size), jnp.float32, -lim_b3, lim_b3)
    return (w1, b1, gamma, beta, w2, b2, w3, b3)


def actor_forward_ref(state, params):
    """Pure-JAX f32 reference faithful to the PyTorch forward (train-mode BN)."""
    w1, b1, gamma, beta, w2, b2, w3, b3 = params
    h1 = jnp.maximum(state @ w1 + b1, 0.0)
    mean = jnp.mean(h1, axis=0, keepdims=True)
    var = jnp.mean((h1 - mean) ** 2, axis=0, keepdims=True)
    h1n = (h1 - mean) / jnp.sqrt(var + 1e-5) * gamma + beta
    h2 = jnp.maximum(h1n @ w2 + b2, 0.0)
    return jnp.tanh(h2 @ w3 + b3)


if __name__ == "__main__":
    # Reacher-like sizes kept small: state_size=33, action_size=4, batch=8.
    state_size, action_size, batch = 33, 4, 8

    key = jax.random.PRNGKey(0)
    k_params, k_state = jax.random.split(key)
    params = init_actor_params(k_params, state_size, action_size)
    state = jax.random.normal(k_state, (batch, state_size), jnp.float32)

    # Pack parameters once (outside the per-step call path).
    w1_bf, w23, v_slab, act = pack_actor_params(params)

    out_padded = actor_forward_packed(state, w1_bf, w23, v_slab)
    out_padded = jax.block_until_ready(out_padded)

    # Consumer-side slice (kept out of the jitted hot path on purpose).
    out = out_padded[:, :act]

    ref = actor_forward_ref(state, params)
    assert out_padded.shape == (batch, LANES), out_padded.shape
    assert out.shape == (batch, action_size), out.shape
    # Padded lanes are exact zeros (tanh(0 + 0) == 0).
    assert bool(jnp.all(jnp.abs(out_padded[:, act:]) == 0.0))
    assert bool(jnp.all(jnp.abs(out) <= 1.0 + 1e-6))
    # bf16 matmul operands (f32 accumulate/BN): loosen tolerance vs f32 ref.
    assert jnp.allclose(out, ref, atol=2e-2), \
        f"max err {jnp.max(jnp.abs(out - ref))}"

    print("KERNEL_OK")
</pallas_src>

<mosaic_0001>
module attributes {stable_mosaic.version = 11 : i64} {
  func.func @actor_kernel(%arg0: memref<8x33xf32, #tpu.memory_space<vmem>>, %arg1: memref<33x128xbf16, #tpu.memory_space<vmem>>, %arg2: memref<256x128xbf16, #tpu.memory_space<vmem>>, %arg3: memref<8x128xf32, #tpu.memory_space<vmem>>, %arg4: memref<8x128xf32, #tpu.memory_space<vmem>>) attributes {dimension_semantics = [], scalar_prefetch = 0 : i64, scratch_operands = 0 : i64, tpu.core_type = #tpu.core_type<tc>} {
    %c0 = arith.constant 0 : index
    %c0_0 = arith.constant 0 : index
    %0 = vector.load %arg0[%c0, %c0_0] : memref<8x33xf32, #tpu.memory_space<vmem>>, vector<8x33xf32>
    %1 = arith.truncf %0 : vector<8x33xf32> to vector<8x33xbf16>
    %c0_1 = arith.constant 0 : index
    %c0_2 = arith.constant 0 : index
    %2 = vector.load %arg1[%c0_1, %c0_2] : memref<33x128xbf16, #tpu.memory_space<vmem>>, vector<33x128xbf16>
    %c0_3 = arith.constant 0 : index
    %c0_4 = arith.constant 0 : index
    %3 = vector.load %arg2[%c0_3, %c0_4] : memref<256x128xbf16, #tpu.memory_space<vmem>>, vector<128x128xbf16>
    %c128 = arith.constant 128 : index
    %c0_5 = arith.constant 0 : index
    %4 = vector.load %arg2[%c128, %c0_5] : memref<256x128xbf16, #tpu.memory_space<vmem>>, vector<128x128xbf16>
    %c0_6 = arith.constant 0 : index
    %c0_7 = arith.constant 0 : index
    %5 = vector.load %arg3[%c0_6, %c0_7] : memref<8x128xf32, #tpu.memory_space<vmem>>, vector<1x128xf32>
    %c1 = arith.constant 1 : index
    %c0_8 = arith.constant 0 : index
    %6 = vector.load %arg3[%c1, %c0_8] : memref<8x128xf32, #tpu.memory_space<vmem>>, vector<1x128xf32>
    %c2 = arith.constant 2 : index
    %c0_9 = arith.constant 0 : index
    %7 = vector.load %arg3[%c2, %c0_9] : memref<8x128xf32, #tpu.memory_space<vmem>>, vector<1x128xf32>
    %c3 = arith.constant 3 : index
    %c0_10 = arith.constant 0 : index
    %8 = vector.load %arg3[%c3, %c0_10] : memref<8x128xf32, #tpu.memory_space<vmem>>, vector<1x128xf32>
    %c4 = arith.constant 4 : index
    %c0_11 = arith.constant 0 : index
    %9 = vector.load %arg3[%c4, %c0_11] : memref<8x128xf32, #tpu.memory_space<vmem>>, vector<1x128xf32>
    %cst = arith.constant dense<0.000000e+00> : vector<8x128xf32>
    %10 = tpu.matmul %1, %2, %cst {dimension_numbers = #tpu.dot_dimension_numbers<[1], [0], [0], [1], [0, 0, 1, 1], [], []>} : vector<8x33xbf16>, vector<33x128xbf16>, vector<8x128xf32> -> vector<8x128xf32>
    %11 = vector.broadcast %5 : vector<1x128xf32> to vector<8x128xf32>
    %12 = arith.addf %10, %11 : vector<8x128xf32>
    %cst_12 = arith.constant 0.000000e+00 : f32
    %13 = vector.broadcast %cst_12 : f32 to vector<8x128xf32>
    %14 = arith.maximumf %12, %13 : vector<8x128xf32>
    %cst_13 = arith.constant dense<0.000000e+00> : vector<128xf32>
    %15 = vector.multi_reduction <add>, %14, %cst_13 [0] : vector<8x128xf32> to vector<128xf32>
    %16 = vector.shape_cast %15 : vector<128xf32> to vector<1x128xf32>
    %cst_14 = arith.constant 1.250000e-01 : f32
    %17 = vector.broadcast %cst_14 : f32 to vector<1x128xf32>
    %18 = arith.mulf %16, %17 : vector<1x128xf32>
    %19 = arith.mulf %14, %14 : vector<8x128xf32>
    %cst_15 = arith.constant dense<0.000000e+00> : vector<128xf32>
    %20 = vector.multi_reduction <add>, %19, %cst_15 [0] : vector<8x128xf32> to vector<128xf32>
    %21 = vector.shape_cast %20 : vector<128xf32> to vector<1x128xf32>
    %cst_16 = arith.constant 1.250000e-01 : f32
    %22 = vector.broadcast %cst_16 : f32 to vector<1x128xf32>
    %23 = arith.mulf %21, %22 : vector<1x128xf32>
    %24 = arith.mulf %18, %18 : vector<1x128xf32>
    %25 = arith.subf %23, %24 : vector<1x128xf32>
    %cst_17 = arith.constant 9.99999974E-6 : f32
    %26 = vector.broadcast %cst_17 : f32 to vector<1x128xf32>
    %27 = arith.addf %25, %26 : vector<1x128xf32>
    %28 = math.rsqrt %27 : vector<1x128xf32>
    %29 = arith.mulf %6, %28 : vector<1x128xf32>
    %30 = arith.mulf %18, %29 : vector<1x128xf32>
    %31 = arith.subf %7, %30 : vector<1x128xf32>
    %32 = vector.broadcast %29 : vector<1x128xf32> to vector<8x128xf32>
    %33 = arith.mulf %14, %32 : vector<8x128xf32>
    %34 = vector.broadcast %31 : vector<1x128xf32> to vector<8x128xf32>
    %35 = arith.addf %33, %34 : vector<8x128xf32>
    %36 = arith.truncf %35 : vector<8x128xf32> to vector<8x128xbf16>
    %cst_18 = arith.constant dense<0.000000e+00> : vector<8x128xf32>
    %37 = tpu.matmul %36, %3, %cst_18 {dimension_numbers = #tpu.dot_dimension_numbers<[1], [0], [0], [1], [0, 0, 1, 1], [], []>} : vector<8x128xbf16>, vector<128x128xbf16>, vector<8x128xf32> -> vector<8x128xf32>
    %38 = vector.broadcast %8 : vector<1x128xf32> to vector<8x128xf32>
    %39 = arith.addf %37, %38 : vector<8x128xf32>
    %cst_19 = arith.constant 0.000000e+00 : f32
    %40 = vector.broadcast %cst_19 : f32 to vector<8x128xf32>
    %41 = arith.maximumf %39, %40 : vector<8x128xf32>
    %42 = arith.truncf %41 : vector<8x128xf32> to vector<8x128xbf16>
    %cst_20 = arith.constant dense<0.000000e+00> : vector<8x128xf32>
    %43 = tpu.matmul %42, %4, %cst_20 {dimension_numbers = #tpu.dot_dimension_numbers<[1], [0], [0], [1], [0, 0, 1, 1], [], []>} : vector<8x128xbf16>, vector<128x128xbf16>, vector<8x128xf32> -> vector<8x128xf32>
    %44 = vector.broadcast %9 : vector<1x128xf32> to vector<8x128xf32>
    %45 = arith.addf %43, %44 : vector<8x128xf32>
    %46 = math.tanh %45 : vector<8x128xf32>
    %c0_21 = arith.constant 0 : index
    %c0_22 = arith.constant 0 : index
    %47 = vector.load %arg4[%c0_21, %c0_22] : memref<8x128xf32, #tpu.memory_space<vmem>>, vector<8x128xf32>
    tpu.vector_store %arg4[%c0_21, %c0_22], %46 {strides = array<i32>} : memref<8x128xf32, #tpu.memory_space<vmem>>, vector<8x128xf32>,
    return
  }
}

</mosaic_0001>

<bundles_post_ra>
// kernel: actor_forward_packed.1
= control target key start
LH: loop header
LB: loop body
LE: loop exit
PB: predicated region body
PF: predicated region fallthrough
CT: control target
= control target key end

     0   :  { %9 = vsyncpa [#allocation3], 0  ;;  %s627_s0 = inlined_call_operand.hbm [shape: f32[8,33], index: 0, kind: input, shape index: {}]   ;;  %s628_s1 = inlined_call_operand.hbm [shape: bf16[33,128], index: 1, kind: input, shape index: {}]   ;;  %s629_s2 = inlined_call_operand.hbm [shape: bf16[256,128], index: 2, kind: input, shape index: {}]   ;;  %s630_s3 = inlined_call_operand.hbm [shape: f32[8,128], index: 3, kind: input, shape index: {}]   ;;  %s631_s4 = inlined_call_operand.hbm [shape: f32[8,128], index: 4, kind: output, shape index: {}]  }
   0x1   :  { %10 = vsyncpa [#allocation6], 0 }
   0x2   :  { %11 = vsyncpa [#allocation9], 0  ;;  %s28_s17 = sshll.u32 %s628_s1, 4  ;;  %s29_s17 = int_to_ptr.hbm [resolvable:$true] %s28_s17 }
   0x3   :  { %12 = vsyncpa [#allocation4], 0  ;;  %s579_s18 = smov [#allocation5]   ;;  %s18_s22 = sshll.u32 %s627_s0, 4  ;;  %s19_s22 = int_to_ptr.hbm [resolvable:$true] %s18_s22 }
   0x4   :  { %s30_s19 = sshll.u32 %s579_s18, 4  ;;  %s580_s23 = smov 64   ;;  %s31_s19 = int_to_ptr.vmem [resolvable:$true] %s30_s19 }
   0x5   :  { %s581_s24 = smov 4   ;;  %s582_s25 = smov [#allocation2]  }
   0x6   :  { %36 = dma.hbm_to_vmem [thread:$0]  %s29_s17, 320, %s31_s19, [#allocation6], %s580_s23, %s580_s23, %s581_s24  }
   0x7   :  { %s20_s26 = sshll.u32 %s582_s25, 4  ;;  %s41_s29 = sshll.u32 %s629_s2, 4  ;;  %s21_s26 = int_to_ptr.vmem [resolvable:$true] %s20_s26  ;;  %s42_s29 = int_to_ptr.hbm [resolvable:$true] %s41_s29 }
   0x8   :  { %23 = dma.hbm_to_vmem [thread:$0]  %s19_s22, 128, %s21_s26, [#allocation3]  }
   0x9   :  { %s55_s5 = sshll.u32 %s630_s3, 4  ;;  %s583_s6 = smov [#allocation7]   ;;  %s56_s5 = int_to_ptr.hbm [resolvable:$true] %s55_s5 }
   0xa   :  { %s43_s7 = sshll.u32 %s583_s6, 4  ;;  %s584_s0 = smov [#allocation8]   ;;  %s44_s7 = int_to_ptr.vmem [resolvable:$true] %s43_s7 }
   0xb   :  { %49 = dma.hbm_to_vmem [thread:$0]  %s42_s29, 2048, %s44_s7, [#allocation6], %s580_s23, %s580_s23, %s581_s24  }
   0xc   :  { %s57_s8 = sshll.u32 %s584_s0, 4  ;;  %s58_s8 = int_to_ptr.vmem [resolvable:$true] %s57_s8 }
   0xd   :  { %60 = dma.hbm_to_vmem [thread:$0]  %s56_s5, 128, %s58_s8, [#allocation9]  }
   0xe   :  { %571 = dma.done.wait [#allocation3], 128  }
   0xf   :  { %572 = vsyncadd [#allocation3], 4294967168 }
  0x10   :  { %573 = dma.done.wait [#allocation6], 2368  }
  0x11   :  { %574 = vsyncadd [#allocation6], 4294964928 }
  0x12   :  { %575 = dma.done.wait [#allocation9], 128  }
  0x13   :  { %576 = vsyncadd [#allocation9], 4294967168  ;;  %vm142_vm0 = vcmask 1040384   ;;  %v84_v0 = vld [vmem:[#allocation5 + $0x10] sm:$0x1]  ;;  %v585_v2 = vmov 0  }
  0x14   :  { %v132_v1 = vunpack.c.l.b16 %v84_v0  ;;  %v144_v3 = vsel %vm142_vm0, 65535, %v585_v2  ;;  %v419_v6 = vld [vmem:[#allocation5 + $0x8] sm:$0xff]  ;;  %v418_v7 = vld [vmem:[#allocation5] sm:$0xff]  ;;  %v78_v8 = vld [vmem:[#allocation2] sm:$0xff]  ;;  %vm138_vm1 = vcmask 269312   ;;  %s586_s2 = smov [#allocation10]  }
  0x15   :  { %v79_v9 = vpack.c.bf16 %v78_v8, %v78_v8  ;;  %v427_v10 = vld [vmem:[#allocation7 + $0x38] sm:$0xff]  ;;  %v426_v11 = vld [vmem:[#allocation7 + $0x30] sm:$0xff]  ;;  %v425_v12 = vld [vmem:[#allocation7 + $0x28] sm:$0xff]  ;;  %s331_s3 = sshll.u32 %s586_s2, 4  ;;  %s333_s11 = sshll.u32 %s631_s4, 4  ;;  %s332_s3 = int_to_ptr.vmem [resolvable:$true] %s331_s3  ;;  %s334_s11 = int_to_ptr.hbm [resolvable:$true] %s333_s11 }
  0x16   :  { %v135_v4 = vpack.c.b16 %v132_v1, %v132_v1  ;;  %247 = vmatpush.bf16.msra.mxu1 %v427_v10  ;;  %v424_v13 = vld [vmem:[#allocation7 + $0x20] sm:$0xff]  ;;  %v423_v15 = vld [vmem:[#allocation7 + $0x18] sm:$0xff]  ;;  %v422_v18 = vld [vmem:[#allocation7 + $0x10] sm:$0xff] }
  0x17   :  { %v444_v14 = vld [vmem:[#allocation8] ss:$0 sm:$0xff]  ;;  %v421_v22 = vld [vmem:[#allocation7 + $0x8] sm:$0xff]  ;;  %v435_v41 = vld [vmem:[#allocation7 + $0x78] sm:$0xff] }
  0x18   :  { %v146_v5 = vand.u32 %v144_v3, %v135_v4  ;;  %v420_v28 = vld [vmem:[#allocation7] sm:$0xff]  ;;  %311 = vmatpush.bf16.msra.mxu2 %v435_v41  ;;  %v434_v42 = vld [vmem:[#allocation7 + $0x70] sm:$0xff]  ;;  %v433_v43 = vld [vmem:[#allocation7 + $0x68] sm:$0xff] }
  0x19   :  { %v432_v46 = vld [vmem:[#allocation7 + $0x60] sm:$0xff]  ;;  %v431_v49 = vld [vmem:[#allocation7 + $0x58] sm:$0xff]  ;;  %v430_v53 = vld [vmem:[#allocation7 + $0x50] sm:$0xff] }
  0x1a   :  { %153 = vmatpush.bf16.msra.mxu0 %v146_v5  ;;  %248 = vmatpush.bf16.msra.mxu1 %v426_v11  ;;  %v118_v51 = vld [vmem:[#allocation8 + $0x1] sm:$0x1]  ;;  %v119_v56 = vld [vmem:[#allocation8 + $0x2] sm:$0x1]  ;;  %v429_v0 = vld [vmem:[#allocation7 + $0x48] sm:$0xff] }
  0x1b   :  { %v428_v1 = vld [vmem:[#allocation7 + $0x40] sm:$0xff] }
  0x1c   :  { %312 = vmatpush.bf16.msra.mxu2 %v434_v42  ;;  %v445_v2 = vld [vmem:[#allocation8 + $0x3] ss:$0 sm:$0xff]  ;;  %v446_v8 = vld [vmem:[#allocation8 + $0x4] ss:$0 sm:$0xff] }
  0x1e   :  { %154 = vmatpush.bf16.msra.mxu0 %v419_v6  ;;  %249 = vmatpush.bf16.msra.mxu1 %v425_v12 }
  0x20   :  { %313 = vmatpush.bf16.msra.mxu2 %v433_v43 }
  0x22   :  { %155 = vmatpush.bf16.msra.mxu0 %v418_v7  ;;  %250 = vmatpush.bf16.msra.mxu1 %v424_v13 }
  0x24   :  { %314 = vmatpush.bf16.msra.mxu2 %v432_v46 }
  0x25   :  { %353 = vmatmul.msk.bf16.vlgmr.msra.gmra.mxu0 %vm138_vm1, %v79_v9 }
  0x26   :  { %251 = vmatpush.bf16.msra.mxu1 %v423_v15 }
  0x28   :  { %315 = vmatpush.bf16.msra.mxu2 %v431_v49 }
  0x2a   :  { %252 = vmatpush.bf16.msra.mxu1 %v422_v18 }
  0x2c   :  { %316 = vmatpush.bf16.msra.mxu2 %v430_v53 }
  0x2e   :  { %253 = vmatpush.bf16.msra.mxu1 %v421_v22 }
  0x30   :  { %317 = vmatpush.bf16.msra.mxu2 %v429_v0 }
  0x32   :  { %254 = vmatpush.bf16.msra.mxu1 %v420_v28 }
  0x34   :  { %318 = vmatpush.bf16.msra.mxu2 %v428_v1 }
  0xa2   :  { %v157_v16 = vpop.f32.mrf.mxu0 }
  0xa3   :  { %v158_v17 = vadd.f32 %v444_v14, %v157_v16 }
  0xa5   :  { %v161_v19 = vmax.f32 %v158_v17, 0.0 }
  0xa7   :  { %v162_v20 = vrot.slane %v161_v19, 4  ;;  %v169_v21 = vmul.f32 %v161_v19, %v161_v19 }
  0xa9   :  { %v163_v23 = vadd.f32 %v162_v20, %v161_v19  ;;  %v170_v24 = vrot.slane %v169_v21, 4 }
  0xaa   :  { %v159_v25 = vpop.f32.mrf.mxu0 }
  0xab   :  { %v164_v26 = vrot.slane %v163_v23, 2  ;;  %v171_v27 = vadd.f32 %v170_v24, %v169_v21 }
  0xad   :  { %v172_v29 = vrot.slane %v171_v27, 2  ;;  %v165_v30 = vadd.f32 %v164_v26, %v163_v23 }
  0xaf   :  { %v173_v31 = vadd.f32 %v172_v29, %v171_v27  ;;  %v166_v32 = vrot.slane %v165_v30, 1 }
  0xb1   :  { %v174_v33 = vrot.slane %v173_v31, 1  ;;  %v167_v34 = vadd.f32 %v166_v32, %v165_v30 }
  0xb3   :  { %v168_v35 = vmul.f32 0.125, %v167_v34  ;;  %v175_v36 = vadd.f32 %v174_v33, %v173_v31 }
  0xb5   :  { %v176_v37 = vmul.f32 0.125, %v175_v36  ;;  %v177_v38 = vmul.f32 %v168_v35, %v168_v35 }
  0xb7   :  { %v178_v39 = vsub.f32 %v176_v37, %v177_v38 }
  0xb9   :  { %v179_v40 = vadd.f32 1e-05, %v178_v39 }
  0xbb   :  { %447 = vrsqrt.f32 %v179_v40  ;;  %vm186_vm3 = vweird.f32 %v179_v40 }
  0xc1   :  { %v448_v44 = vpop.eup %447 }
  0xc2   :  { %v181_v45 = vmul.f32 %v448_v44, %v179_v40  ;;  %vm187_vm2 = vweird.f32 %v448_v44 }
  0xc3   :  { %vm188_vm4 = vmor %vm186_vm3, %vm187_vm2 }
  0xc4   :  { %v182_v47 = vmul.f32 %v448_v44, %v181_v45 }
  0xc6   :  { %v183_v48 = vmul.f32 0.5, %v182_v47 }
  0xc8   :  { %v184_v50 = vsub.f32 1.5, %v183_v48 }
  0xca   :  { %v185_v52 = vmul.f32 %v448_v44, %v184_v50 }
  0xcc   :  { %v189_v54 = vsel %vm188_vm4, %v448_v44, %v185_v52 }
  0xcd   :  { %v190_v55 = vmul.f32 %v189_v54, %v118_v51 }
  0xcf   :  { %v191_v57 = vmul.f32 %v190_v55, %v168_v35  ;;  %v193_v58 = vperm.slane %v190_v55, 0 }
  0xd1   :  { %v192_v59 = vsub.f32 %v119_v56, %v191_v57  ;;  %v194_v60 = vmul.f32 %v193_v58, %v161_v19 }
  0xd3   :  { %v195_v61 = vperm.slane %v192_v59, 0 }
  0xd5   :  { %v196_v62 = vadd.f32 %v195_v61, %v194_v60 }
  0xd7   :  { %v197_v63 = vpack.c.bf16 %v196_v62, %v196_v62 }
  0xd9   :  { %255 = vmatmul.bf16.vlgmr.msra.gmra.mxu1 %v197_v63 }
 0x156   :  { %v256_v3 = vpop.f32.mrf.mxu1 }
 0x157   :  { %v257_v4 = vadd.f32 %v445_v2, %v256_v3 }
 0x159   :  { %v260_v5 = vmax.f32 %v257_v4, 0.0 }
 0x15b   :  { %v261_v6 = vpack.c.bf16 %v260_v5, %v260_v5 }
 0x15d   :  { %319 = vmatmul.bf16.vlgmr.msra.gmra.mxu2 %v261_v6 }
 0x15e   :  { %v258_v7 = vpop.f32.mrf.mxu1 }
 0x1e0   :  { %v320_v9 = vpop.f32.mrf.mxu2 }
 0x1e1   :  { %v321_v10 = vadd.f32 %v446_v8, %v320_v9 }
 0x1e3   :  { %449 = vtanh.f32 %v321_v10 }
 0x1e8   :  { %v322_v11 = vpop.f32.mrf.mxu2 }
 0x1e9   :  { %v450_v12 = vpop.eup %449 }
 0x1ea   :  { %325 = vst [vmem:[#allocation10] sm:$0xff] %v450_v12 }
 0x1eb   :  { %336 = dma.vmem_to_hbm [thread:$0]  %s332_s3, 128, %s334_s11, [#allocation4]  }
 0x1ec   :  { %577 = dma.done.wait [#allocation4], 128  }
 0x1ed   :  { %578 = vsyncadd [#allocation4], 4294967168 }
 0x1ee   :  { %341 = vsyncpa [#allocation3], 1 }
 0x1ef   :  { %342 = vsyncpa [#allocation6], 1 }
 0x1f0   :  { %343 = vsyncpa [#allocation9], 1 }
 0x1f1   :  { %344 = vsyncpa [#allocation4], 1 }

</bundles_post_ra>
